<compile_context>
chip_gen: v7x
topology: tpu7x:2x2x1
jax: 0.10.0
libtpu: 0.0.40
codegen_flags: <defaults>
</compile_context>

<pallas_src>
import functools

import jax
import jax.numpy as jnp
from jax.experimental import pallas as pl
from jax.experimental.pallas import tpu as pltpu


# ---------------------------------------------------------------------------
# Fused kernel: whole MLP in one body, weights resident in VMEM.
# ---------------------------------------------------------------------------
def _bridge_fused_kernel(*refs, num_layers: int):
    # refs = (x_ref, w0_ref, b0_ref, ..., wL_ref, bL_ref, out_ref)
    x_ref = refs[0]
    out_ref = refs[-1]
    wb_refs = refs[1:-1]

    x = x_ref[...].astype(jnp.float32)
    for l in range(num_layers):                       # static -> fully unrolled
        w = wb_refs[2 * l][...]
        b = wb_refs[2 * l + 1][...]                   # (1, out) broadcast add
        y = jnp.dot(x, w, preferred_element_type=jnp.float32) + b
        if l < num_layers - 1:                        # hidden layers: ReLU
            y = jnp.maximum(y, 0.0)
        x = y
    # Single lane-dense store of the full (batch_tile, 2*out_features) result.
    out_ref[...] = x.astype(out_ref.dtype)


# ---------------------------------------------------------------------------
# Wrapper
# ---------------------------------------------------------------------------
def bridge_forward(params, x, *, out_features, batch_tile=None):
    """Fused Bridge forward. Returns (betas, gammas) with gammas already +1."""
    # Fold the "+1" on the gamma half into the last layer's bias (exact).
    w_last, b_last = params[-1]
    gamma_offset = jnp.concatenate(
        [jnp.zeros((1, out_features), b_last.dtype),
         jnp.ones((1, out_features), b_last.dtype)], axis=1)
    layer_params = list(params[:-1]) + [(w_last, b_last + gamma_offset)]

    B, in_dim = x.shape
    out_dim = 2 * out_features
    num_layers = len(layer_params)

    # Batch tiling: for small batches one grid step (everything fits in VMEM);
    # for large batches tile rows so the "parallel" axis can be sharded across
    # TensorCores (v7x) and activation tiles stay small.
    if batch_tile is None:
        batch_tile = B
        for cand in (1024, 512, 256, 128):
            if B > cand and B % cand == 0:
                batch_tile = cand
                break
    assert B % batch_tile == 0
    nb = B // batch_tile

    # Build flat arg list + specs: activations tile over batch, weights/biases
    # always map to block (0, 0) so they stay resident across grid steps.
    flat_args = [x]
    in_specs = [pl.BlockSpec((batch_tile, in_dim), lambda i: (i, 0))]
    for (w, b) in layer_params:
        flat_args += [w, b]
        in_specs.append(pl.BlockSpec(w.shape, lambda i: (0, 0)))
        in_specs.append(pl.BlockSpec(b.shape, lambda i: (0, 0)))

    # Advisory cost estimate for XLA scheduling around the fused custom call.
    flops = 2 * B * sum(w.shape[0] * w.shape[1] for (w, _) in layer_params)
    bytes_accessed = (
        x.size * x.dtype.itemsize
        + sum(w.size * w.dtype.itemsize + b.size * b.dtype.itemsize
              for (w, b) in layer_params)
        + B * out_dim * x.dtype.itemsize)

    y = pl.pallas_call(
        functools.partial(_bridge_fused_kernel, num_layers=num_layers),
        out_shape=jax.ShapeDtypeStruct((B, out_dim), x.dtype),
        grid=(nb,),
        in_specs=in_specs,
        out_specs=pl.BlockSpec((batch_tile, out_dim), lambda i: (i, 0)),
        compiler_params=pltpu.CompilerParams(
            dimension_semantics=("parallel",),      # megacore-shardable on v7x
            # Resident weights + double-buffered activation tiles here are
            # KiB-scale; 32 MiB fits every generation's scoped VMEM (v7x: 64 MiB
            # physical).  Revisit if hidden width / batch_tile grows.
            vmem_limit_bytes=32 * 1024 * 1024),
        cost_estimate=pl.CostEstimate(
            flops=flops, transcendentals=0, bytes_accessed=bytes_accessed),
    )(*flat_args)

    # Cheap split outside the kernel (keeps the kernel store lane-dense).
    betas = y[:, :out_features]
    gammas = y[:, out_features:]          # +1 already folded into b_last
    return betas, gammas


# ---------------------------------------------------------------------------
# Parameter init (mimics nn.Linear's U(-1/sqrt(fan_in), 1/sqrt(fan_in)))
# ---------------------------------------------------------------------------
def init_bridge_params(key, in_features, num_hid_features, out_features,
                       num_hid_layers, dtype=jnp.float32):
    params = []
    dims_in, dims_out = [], []
    for i in range(num_hid_layers):
        dims_in.append(in_features if i == 0 else num_hid_features)
        dims_out.append(num_hid_features)
    dims_in.append(num_hid_features if num_hid_layers > 0 else in_features)
    dims_out.append(out_features * 2)

    for din, dout in zip(dims_in, dims_out):
        key, kw, kb = jax.random.split(key, 3)
        bound = 1.0 / jnp.sqrt(jnp.asarray(din, dtype))
        w = jax.random.uniform(kw, (din, dout), dtype, minval=-bound, maxval=bound)
        b = jax.random.uniform(kb, (1, dout), dtype, minval=-bound, maxval=bound)
        params.append((w, b))
    return params


# Pure-JAX reference (matches the original module semantics) for verification.
def bridge_reference(params, x, *, out_features):
    for (w, b) in params[:-1]:
        x = jnp.maximum(x @ w + b, 0.0)
    w, b = params[-1]
    y = x @ w + b
    return y[:, :out_features], y[:, out_features:] + 1.0


if __name__ == "__main__":
    # Small shapes consistent with the module's forward.
    batch = 8
    in_features = 32
    num_hid_features = 64
    out_features = 16
    num_hid_layers = 2

    key = jax.random.PRNGKey(0)
    k_params, k_x = jax.random.split(key)
    params = init_bridge_params(k_params, in_features, num_hid_features,
                                out_features, num_hid_layers)
    x = jax.random.normal(k_x, (batch, in_features), dtype=jnp.float32)

    betas, gammas = bridge_forward(params, x, out_features=out_features)
    jax.block_until_ready(betas)
    jax.block_until_ready(gammas)

    ref_betas, ref_gammas = bridge_reference(params, x, out_features=out_features)
    assert betas.shape == (batch, out_features)
    assert gammas.shape == (batch, out_features)
    assert jnp.allclose(betas, ref_betas, atol=1e-5, rtol=1e-5)
    assert jnp.allclose(gammas, ref_gammas, atol=1e-5, rtol=1e-5)

    print("KERNEL_OK")
</pallas_src>

<mosaic_0001>
module attributes {stable_mosaic.version = 11 : i64} {
  func.func @_bridge_fused_kernel(%arg0: i32, %arg1: memref<8x32xf32, #tpu.memory_space<vmem>>, %arg2: memref<32x64xf32, #tpu.memory_space<vmem>>, %arg3: memref<1x64xf32, #tpu.memory_space<vmem>>, %arg4: memref<64x64xf32, #tpu.memory_space<vmem>>, %arg5: memref<1x64xf32, #tpu.memory_space<vmem>>, %arg6: memref<64x32xf32, #tpu.memory_space<vmem>>, %arg7: memref<1x32xf32, #tpu.memory_space<vmem>>, %arg8: memref<8x32xf32, #tpu.memory_space<vmem>>) attributes {dimension_semantics = [#tpu.dimension_semantics<parallel>], iteration_bounds = array<i64: 1>, scalar_prefetch = 0 : i64, scratch_operands = 0 : i64, tpu.core_type = #tpu.core_type<tc>, window_params = [{transform_indices = @transform_0, window_bounds = array<i64: 8, 32>}, {pipeline_mode = #tpu.pipeline_mode<synchronous>, transform_indices = @transform_1, window_bounds = array<i64: 32, 64>}, {pipeline_mode = #tpu.pipeline_mode<synchronous>, transform_indices = @transform_2, window_bounds = array<i64: 1, 64>}, {pipeline_mode = #tpu.pipeline_mode<synchronous>, transform_indices = @transform_3, window_bounds = array<i64: 64, 64>}, {pipeline_mode = #tpu.pipeline_mode<synchronous>, transform_indices = @transform_4, window_bounds = array<i64: 1, 64>}, {pipeline_mode = #tpu.pipeline_mode<synchronous>, transform_indices = @transform_5, window_bounds = array<i64: 64, 32>}, {pipeline_mode = #tpu.pipeline_mode<synchronous>, transform_indices = @transform_6, window_bounds = array<i64: 1, 32>}, {transform_indices = @transform_7, window_bounds = array<i64: 8, 32>}]} {
    %c0 = arith.constant 0 : index
    %c0_0 = arith.constant 0 : index
    %0 = vector.load %arg1[%c0, %c0_0] : memref<8x32xf32, #tpu.memory_space<vmem>>, vector<8x32xf32>
    %c0_1 = arith.constant 0 : index
    %c0_2 = arith.constant 0 : index
    %1 = vector.load %arg2[%c0_1, %c0_2] : memref<32x64xf32, #tpu.memory_space<vmem>>, vector<32x64xf32>
    %c0_3 = arith.constant 0 : index
    %c0_4 = arith.constant 0 : index
    %2 = vector.load %arg3[%c0_3, %c0_4] : memref<1x64xf32, #tpu.memory_space<vmem>>, vector<1x64xf32>
    %cst = arith.constant dense<0.000000e+00> : vector<8x64xf32>
    %3 = tpu.matmul %0, %1, %cst {dimension_numbers = #tpu.dot_dimension_numbers<[1], [0], [0], [1], [0, 0, 1, 1], [], []>} : vector<8x32xf32>, vector<32x64xf32>, vector<8x64xf32> -> vector<8x64xf32>
    %4 = vector.broadcast %2 : vector<1x64xf32> to vector<8x64xf32>
    %5 = arith.addf %3, %4 : vector<8x64xf32>
    %cst_5 = arith.constant 0.000000e+00 : f32
    %6 = vector.broadcast %cst_5 : f32 to vector<8x64xf32>
    %7 = arith.maximumf %5, %6 : vector<8x64xf32>
    %c0_6 = arith.constant 0 : index
    %c0_7 = arith.constant 0 : index
    %8 = vector.load %arg4[%c0_6, %c0_7] : memref<64x64xf32, #tpu.memory_space<vmem>>, vector<64x64xf32>
    %c0_8 = arith.constant 0 : index
    %c0_9 = arith.constant 0 : index
    %9 = vector.load %arg5[%c0_8, %c0_9] : memref<1x64xf32, #tpu.memory_space<vmem>>, vector<1x64xf32>
    %cst_10 = arith.constant dense<0.000000e+00> : vector<8x64xf32>
    %10 = tpu.matmul %7, %8, %cst_10 {dimension_numbers = #tpu.dot_dimension_numbers<[1], [0], [0], [1], [0, 0, 1, 1], [], []>} : vector<8x64xf32>, vector<64x64xf32>, vector<8x64xf32> -> vector<8x64xf32>
    %11 = vector.broadcast %9 : vector<1x64xf32> to vector<8x64xf32>
    %12 = arith.addf %10, %11 : vector<8x64xf32>
    %cst_11 = arith.constant 0.000000e+00 : f32
    %13 = vector.broadcast %cst_11 : f32 to vector<8x64xf32>
    %14 = arith.maximumf %12, %13 : vector<8x64xf32>
    %c0_12 = arith.constant 0 : index
    %c0_13 = arith.constant 0 : index
    %15 = vector.load %arg6[%c0_12, %c0_13] : memref<64x32xf32, #tpu.memory_space<vmem>>, vector<64x32xf32>
    %c0_14 = arith.constant 0 : index
    %c0_15 = arith.constant 0 : index
    %16 = vector.load %arg7[%c0_14, %c0_15] : memref<1x32xf32, #tpu.memory_space<vmem>>, vector<1x32xf32>
    %cst_16 = arith.constant dense<0.000000e+00> : vector<8x32xf32>
    %17 = tpu.matmul %14, %15, %cst_16 {dimension_numbers = #tpu.dot_dimension_numbers<[1], [0], [0], [1], [0, 0, 1, 1], [], []>} : vector<8x64xf32>, vector<64x32xf32>, vector<8x32xf32> -> vector<8x32xf32>
    %18 = vector.broadcast %16 : vector<1x32xf32> to vector<8x32xf32>
    %19 = arith.addf %17, %18 : vector<8x32xf32>
    %c0_17 = arith.constant 0 : index
    %c0_18 = arith.constant 0 : index
    %20 = vector.load %arg8[%c0_17, %c0_18] : memref<8x32xf32, #tpu.memory_space<vmem>>, vector<8x32xf32>
    tpu.vector_store %arg8[%c0_17, %c0_18], %19 {strides = array<i32>} : memref<8x32xf32, #tpu.memory_space<vmem>>, vector<8x32xf32>,
    return
  }
  func.func @transform_0(%arg0: i32) -> (i32, i32) {
    %c0_i32 = arith.constant 0 : i32
    %c0_i32_0 = arith.constant 0 : i32
    return %arg0, %c0_i32 : i32, i32
  }
  func.func @transform_1(%arg0: i32) -> (i32, i32) {
    %c0_i32 = arith.constant 0 : i32
    %c0_i32_0 = arith.constant 0 : i32
    %c0_i32_1 = arith.constant 0 : i32
    return %c0_i32, %c0_i32_0 : i32, i32
  }
  func.func @transform_2(%arg0: i32) -> (i32, i32) {
    %c0_i32 = arith.constant 0 : i32
    %c0_i32_0 = arith.constant 0 : i32
    %c0_i32_1 = arith.constant 0 : i32
    return %c0_i32, %c0_i32_0 : i32, i32
  }
  func.func @transform_3(%arg0: i32) -> (i32, i32) {
    %c0_i32 = arith.constant 0 : i32
    %c0_i32_0 = arith.constant 0 : i32
    %c0_i32_1 = arith.constant 0 : i32
    return %c0_i32, %c0_i32_0 : i32, i32
  }
  func.func @transform_4(%arg0: i32) -> (i32, i32) {
    %c0_i32 = arith.constant 0 : i32
    %c0_i32_0 = arith.constant 0 : i32
    %c0_i32_1 = arith.constant 0 : i32
    return %c0_i32, %c0_i32_0 : i32, i32
  }
  func.func @transform_5(%arg0: i32) -> (i32, i32) {
    %c0_i32 = arith.constant 0 : i32
    %c0_i32_0 = arith.constant 0 : i32
    %c0_i32_1 = arith.constant 0 : i32
    return %c0_i32, %c0_i32_0 : i32, i32
  }
  func.func @transform_6(%arg0: i32) -> (i32, i32) {
    %c0_i32 = arith.constant 0 : i32
    %c0_i32_0 = arith.constant 0 : i32
    %c0_i32_1 = arith.constant 0 : i32
    return %c0_i32, %c0_i32_0 : i32, i32
  }
  func.func @transform_7(%arg0: i32) -> (i32, i32) {
    %c0_i32 = arith.constant 0 : i32
    %c0_i32_0 = arith.constant 0 : i32
    return %arg0, %c0_i32 : i32, i32
  }
}

</mosaic_0001>

<bundles_post_ra>
// kernel: tpu_custom_call.1
= control target key start
LH: loop header
LB: loop body
LE: loop exit
PB: predicated region body
PF: predicated region fallthrough
CT: control target
= control target key end

     0   :  { %v443_v3 = vmov 0.0|0.0   ;;  %vm444_vm0 = vmmov 0   ;;  %v445_v6 = vmov 0.0   ;;  %s576_s0 = inlined_call_operand.vmem [shape: f32[8,32], index: 0, kind: input, shape index: {}]   ;;  %s577_s1 = inlined_call_operand.vmem [shape: f32[32,64], index: 1, kind: input, shape index: {}]   ;;  %s578_s2 = inlined_call_operand.vmem [shape: f32[1,64], index: 2, kind: input, shape index: {}]   ;;  %s579_s3 = inlined_call_operand.vmem [shape: f32[64,64], index: 3, kind: input, shape index: {}]   ;;  %s580_s4 = inlined_call_operand.vmem [shape: f32[1,64], index: 4, kind: input, shape index: {}]   ;;  %s581_s5 = inlined_call_operand.vmem [shape: f32[64,32], index: 5, kind: input, shape index: {}]   ;;  %s582_s6 = inlined_call_operand.vmem [shape: f32[1,32], index: 6, kind: input, shape index: {}]   ;;  %s583_s7 = inlined_call_operand.hbm [shape: f32[8,32], index: 7, kind: output, shape index: {}]  }
   0x1   :  { %v28_v0 = vld [vmem:[%s577_s1] sm:$0xff]  ;;  %v29_v1 = vld [vmem:[%s577_s1 + $0x8] sm:$0xff]  ;;  %v30_v2 = vld [vmem:[%s577_s1 + $0x10] sm:$0xff]  ;;  %385 = vmatprep.subr.bf16.mxu0 %v443_v3  ;;  %344 = vmatprep.mubr.msk.f32.mxu0 %vm444_vm0, %v445_v6 }
   0x2   :  { %v386_v4 = vpack.c.bf16 %v29_v1, %v28_v0  ;;  %v31_v5 = vld [vmem:[%s577_s1 + $0x18] sm:$0xff]  ;;  %v114_v7 = vld [vmem:[%s579_s3] sm:$0xff]  ;;  %391 = vmatprep.subr.bf16.mxu1 %v443_v3  ;;  %v115_v8 = vld [vmem:[%s579_s3 + $0x8] sm:$0xff]  ;;  %363 = vmatprep.mubr.msk.f32.mxu1 %vm444_vm0, %v445_v6 }
   0x3   :  { %v116_v9 = vld [vmem:[%s579_s3 + $0x10] sm:$0xff]  ;;  %v117_v10 = vld [vmem:[%s579_s3 + $0x18] sm:$0xff]  ;;  %v389_v11 = vpack.c.bf16 %v31_v5, %v30_v2  ;;  %v392_v12 = vpack.c.bf16 %v115_v8, %v114_v7 }
   0x4   :  { %387 = vmatpush3.bf16.msra.mxu0 %v386_v4 }
   0x5   :  { %388 = vmatprep.subr.bf16.mxu0 %v443_v3 }
   0x6   :  { %12 = vsyncpa [#allocation3], 0  ;;  %393 = vmatpush3.bf16.msra.mxu1 %v392_v12  ;;  %v395_v13 = vpack.c.bf16 %v117_v10, %v116_v9  ;;  %v118_v14 = vld [vmem:[%s579_s3 + $0x20] sm:$0xff]  ;;  %v119_v15 = vld [vmem:[%s579_s3 + $0x28] sm:$0xff]  ;;  %vm39_vm1 = vcmask 261120   ;;  %vm129_vm2 = vcmask 523264  }
   0x7   :  { %394 = vmatprep.subr.bf16.mxu1 %v443_v3  ;;  %v27_v16 = vld [vmem:[%s576_s0] sm:$0xff]  ;;  %v398_v17 = vpack.c.bf16 %v119_v15, %v118_v14  ;;  %v120_v18 = vld [vmem:[%s579_s3 + $0x30] sm:$0xff]  ;;  %v121_v19 = vld [vmem:[%s579_s3 + $0x38] sm:$0xff]  ;;  %s446_s21 = smov [#allocation2]  }
   0x8   :  { %390 = vmatpush3.bf16.msra.mxu0 %v389_v11  ;;  %v401_v20 = vpack.c.bf16 %v121_v19, %v120_v18  ;;  %v204_v21 = vld [vmem:[%s581_s5] sm:$0xff]  ;;  %v205_v22 = vld [vmem:[%s581_s5 + $0x8] sm:$0xff]  ;;  %v206_v23 = vld [vmem:[%s581_s5 + $0x10] sm:$0xff]  ;;  %s299_s22 = sshll.u32 %s446_s21, 4  ;;  %s300_s22 = int_to_ptr.vmem [resolvable:$true] %s299_s22 }
   0x9   :  { %403 = vmatprep.subr.bf16.mxu0 %v443_v3  ;;  %v404_v24 = vpack.c.bf16 %v205_v22, %v204_v21  ;;  %v207_v25 = vld [vmem:[%s581_s5 + $0x18] sm:$0xff]  ;;  %v208_v27 = vld [vmem:[%s581_s5 + $0x20] sm:$0xff]  ;;  %v209_v28 = vld [vmem:[%s581_s5 + $0x28] sm:$0xff]  ;;  %p424_p1 = scmp.lt.s32.totalorder %s300_s22, %s300_s22 }
   0xa   :  { %396 = vmatpush3.bf16.msra.mxu1 %v395_v13  ;;  %v407_v26 = vpack.c.bf16 %v207_v25, %v206_v23  ;;  %v410_v29 = vpack.c.bf16 %v209_v28, %v208_v27  ;;  %v307_v30 = vld [vmem:[%s578_s2] ss:$0 sm:$0xff]  ;;  %v210_v35 = vld [vmem:[%s581_s5 + $0x30] sm:$0xff]  ;;  %v211_v36 = vld [vmem:[%s581_s5 + $0x38] sm:$0xff]  ;;  %s419_s5 = scalar_lea.vmem %s300_s22, 128 }
   0xb   :  { %345 = vmatmul.mubr.msk.f32.vlgmr.msra.gmra.mrb[0].mxu0 %vm39_vm1, %v27_v16  ;;  %397 = vmatprep.subr.bf16.mxu1 %v443_v3  ;;  %v413_v37 = vpack.c.bf16 %v211_v36, %v210_v35  ;;  %v309_v38 = vld [vmem:[%s580_s4] ss:$0 sm:$0xff]  ;;  %p420_p0 = scmp.ne.s32.totalorder %s300_s22, %s419_s5  ;;  %p425_p2 = scmp.lt.s32.totalorder %s419_s5, %s419_s5 }
   0xc   :  { %382 = vmatprep.mubr.msk.f32.mxu0 %vm444_vm0, %v445_v6  ;;  %405 = vmatpush3.bf16.msra.mxu0 %v404_v24  ;;  %v311_v43 = vld [vmem:[%s582_s6] ss:$0 sm:$0xff] }
   0xd   :  { %406 = vmatprep.subr.bf16.mxu0 %v443_v3  ;;  %p426_p3 = por %p425_p2, %p424_p1 }
   0xe   :  { %399 = vmatpush3.bf16.msra.mxu1 %v398_v17 }
   0xf   :  { %400 = vmatprep.subr.bf16.mxu1 %v443_v3  ;;  %p427_p4 = pnand %p426_p3, %p420_p0 }
  0x10   :  { %408 = vmatpush3.bf16.msra.mxu0 %v407_v26 }
  0x11   :  { %409 = vmatprep.subr.bf16.mxu0 %v443_v3 }
  0x12   :  { %402 = vmatpush3.bf16.msra.mxu1 %v401_v20 }
  0x14   :  { %411 = vmatpush3.bf16.msra.mxu0 %v410_v29 }
  0x15   :  { %412 = vmatprep.subr.bf16.mxu0 %v443_v3 }
  0x18   :  { %414 = vmatpush3.bf16.msra.mxu0 %v413_v37 }
  0xde   :  { %v109_v31 = vpop.f32.mrb[0].mxu0 }
  0xdf   :  { %v110_v32 = vadd.f32 %v307_v30, %v109_v31  ;;  %v346_v33 = vpop.f32.mrb[1].mxu0 }
  0xe1   :  { %v113_v34 = vmax.f32 %v110_v32, 0.0 }
  0xe3   :  { %364 = vmatmul.mubr.msk.f32.vlgmr.msra.gmra.mrb[0].mxu1 %vm129_vm2, %v113_v34 }
 0x1b6   :  { %v199_v39 = vpop.f32.mrb[0].mxu1 }
 0x1b7   :  { %v200_v40 = vadd.f32 %v309_v38, %v199_v39  ;;  %v365_v41 = vpop.f32.mrb[1].mxu1 }
 0x1b9   :  { %v203_v42 = vmax.f32 %v200_v40, 0.0 }
 0x1bb   :  { %383 = vmatmul.mubr.msk.f32.vlgmr.msra.gmra.mrb[2].mxu0 %vm129_vm2, %v203_v42 }
 0x28e   :  { %v288_v44 = vpop.f32.mrb[2].mxu0 }
 0x28f   :  { %v289_v45 = vadd.f32 %v311_v43, %v288_v44  ;;  %v384_v46 = vpop.f32.mrb[3].mxu0 }
 0x291   :  { %292 = vst.msk [vmem:[#allocation2] sm:$0xff] %vm39_vm1, %v289_v45 }
 0x292   :  { %430 = shalt.err (!%p427_p4)
}
 0x293   :  { %s431_s24 = scalar_lea.hbm %s583_s7, 128 }
 0x294   :  { %p432_p5 = scmp.ne.s32.totalorder %s583_s7, %s431_s24  ;;  %p435_p6 = scmp.lt.u32.totalorder %s431_s24, %s583_s7 }
 0x296   :  { %p437_p7 = pnand %p435_p6, %p432_p5 }
 0x298   :  { %440 = shalt.err (!%p437_p7)
}
 0x299   :  { %302 = dma.vmem_to_hbm [thread:$0]  %s300_s22, 128, %s583_s7, [#allocation3]  }
 0x29a   :  { %441 = dma.done.wait [#allocation3], 128  }
 0x29b   :  { %442 = vsyncadd [#allocation3], 4294967168 }
 0x29c   :  { %306 = vsyncpa [#allocation3], 1 }

</bundles_post_ra>
